<compile_context>
chip_gen: v7x
topology: tpu7x:2x2x1
jax: 0.10.0
libtpu: 0.0.40
codegen_flags: <defaults>
</compile_context>

<pallas_src>
import jax
import jax.numpy as jnp
from jax.experimental import pallas as pl
from jax.experimental.pallas import tpu as pltpu

_LANE = 128
_SUBLANE = 8


def _round_up(x, m):
    return (x + m - 1) // m * m


def _dpp_fused_kernel(x_ref, w1_ref, b1_ref, w2_ref, b2_ref, o_ref):
    # x arrives f32 straight from HBM; cast to bf16 on the VPU (no extra
    # wrapper-side pad/cast round trip through HBM).
    x = x_ref[...].astype(jnp.bfloat16)
    # dpp_layer1: x @ W1 on the MXU with f32 accumulation.
    h = jnp.dot(x, w1_ref[...], preferred_element_type=jnp.float32)
    # bias + ReLU epilogue in f32 on the VPU.
    h = jnp.maximum(h + b1_ref[...], 0.0)
    # fc_out: relu(h) @ W2 (activation fed back to the MXU in bf16) + b2.
    out = jnp.dot(h.astype(jnp.bfloat16), w2_ref[...],
                  preferred_element_type=jnp.float32)
    o_ref[...] = (out + b2_ref[...]).astype(o_ref.dtype)


def prepare_params(w1, b1, w2, b2):
    """One-time repack of the Linear weights for the fused kernel.

    w1 : (D_in, H) = dpp_layer1.weight.T     b1 : (H,)
    w2 : (H, O)    = fc_out.weight.T         b2 : (O,)

    Pads H and O to lane multiples (128) and casts matmul operands to bf16.
    Call once at model init and reuse across forwards so the repack never
    shows up in per-call HBM traffic.  Zero padding is exact: padded hidden
    units get zero weight + zero bias -> relu -> 0 contribution, and padded
    output columns are sliced off in the forward.
    """
    d_in, h = w1.shape
    o = w2.shape[1]
    hp = _round_up(h, _LANE)
    op = _round_up(o, _LANE)
    f32, bf16 = jnp.float32, jnp.bfloat16
    return {
        "w1": jnp.zeros((d_in, hp), bf16).at[:, :h].set(w1.astype(bf16)),
        "b1": jnp.zeros((1, hp), f32).at[0, :h].set(b1.astype(f32)),
        "w2": jnp.zeros((hp, op), bf16).at[:h, :o].set(w2.astype(bf16)),
        "b2": jnp.zeros((1, op), f32).at[0, :o].set(b2.astype(f32)),
        "d_in": d_in, "h": h, "o": o,
    }


def _plan_batch_tile(b, d_in, hp, op, batch_tile, vmem_budget_bytes):
    """Pick the batch tile from an explicit VMEM budget (+ megacore rule)."""
    # Resident (single-buffered) parameter bytes.
    param_bytes = (d_in * hp + hp * op) * 2 + (hp + op) * 4
    # Per batch-row VMEM bytes: double-buffered f32 x / out tiles plus the
    # in-kernel intermediates (x bf16, h f32, h bf16, pre-bias out f32).
    per_row = 2 * 4 * d_in + 2 * 4 * op + 2 * d_in + 6 * hp + 4 * op
    if vmem_budget_bytes is None:
        # Conservative cross-generation default: fits v5e's smaller scoped
        # envelope and leaves headroom under v7x's 32 MiB scoped / 64 MiB
        # physical VMEM.
        vmem_budget_bytes = 20 << 20
    avail = max(vmem_budget_bytes - param_bytes, _SUBLANE * per_row)
    tb_cap = max((avail // per_row) // _SUBLANE * _SUBLANE, _SUBLANE)

    tb = 512 if batch_tile is None else int(batch_tile)
    tb = max(_SUBLANE, min(_round_up(tb, _SUBLANE), tb_cap))
    # Guarantee >= 2 grid steps whenever possible so the "parallel" batch
    # axis can actually shard across v7x's two TensorCores.
    if b > _SUBLANE:
        tb = min(tb, _round_up(pl.cdiv(b, 2), _SUBLANE))
    tb = min(tb, _round_up(b, _SUBLANE))

    bp = _round_up(b, tb)
    needed = param_bytes + tb * per_row
    # Explicit scoped-VMEM limit derived from the actual buffers, with
    # headroom for compiler-internal scratch; capped at v7x physical VMEM.
    vmem_limit = int(min(max(2 * needed + (1 << 20), 32 << 20), 64 << 20))
    return tb, bp, vmem_limit


def dpp_forward(x, params, *, batch_tile=None, vmem_budget_bytes=None,
                out_dtype=jnp.float32):
    """Fused forward relu(x @ w1 + b1) @ w2 + b2 with pre-packed params."""
    b, d_in = x.shape
    assert d_in == params["d_in"], (d_in, params["d_in"])
    hp = params["w1"].shape[1]
    op = params["w2"].shape[1]
    o = params["o"]

    tb, bp, vmem_limit = _plan_batch_tile(b, d_in, hp, op, batch_tile,
                                          vmem_budget_bytes)
    x_in = x if bp == b else jnp.zeros((bp, d_in), x.dtype).at[:b].set(x)
    grid = (bp // tb,)

    flops = 2 * bp * (d_in * hp + hp * op)
    bytes_accessed = (bp * d_in * 4                     # x (f32)
                      + (d_in * hp + hp * op) * 2       # weights (bf16)
                      + (hp + op) * 4                   # biases (f32)
                      + bp * op * jnp.dtype(out_dtype).itemsize)

    def _call(single_buffer_params):
        if single_buffer_params:
            def const(shape):
                return pl.BlockSpec(shape, lambda i: (0, 0),
                                    pipeline_mode=pl.Buffered(1))
        else:
            def const(shape):
                return pl.BlockSpec(shape, lambda i: (0, 0))
        return pl.pallas_call(
            _dpp_fused_kernel,
            out_shape=jax.ShapeDtypeStruct((bp, op), out_dtype),
            grid_spec=pltpu.PrefetchScalarGridSpec(
                num_scalar_prefetch=0,
                grid=grid,
                in_specs=[
                    pl.BlockSpec((tb, d_in), lambda i: (i, 0)),  # x: batch-tiled
                    const((d_in, hp)),                           # w1 (resident)
                    const((1, hp)),                              # b1 (resident)
                    const((hp, op)),                             # w2 (resident)
                    const((1, op)),                              # b2 (resident)
                ],
                out_specs=pl.BlockSpec((tb, op), lambda i: (i, 0)),
            ),
            compiler_params=pltpu.CompilerParams(
                # batch axis is reduction-free -> shardable across v7x's 2 TCs
                dimension_semantics=("parallel",),
                vmem_limit_bytes=vmem_limit),
            cost_estimate=pl.CostEstimate(
                flops=flops, transcendentals=0,
                bytes_accessed=bytes_accessed),
        )(x_in, params["w1"], params["b1"], params["w2"], params["b2"])

    try:
        out_p = _call(True)
    except Exception:  # fallback if this JAX rejects Buffered(1) here
        out_p = _call(False)

    # Padded rows / columns are exactly zero and sliced off.  Keep B and O
    # lane-aligned in production (or jit this together with the consumer) to
    # make this slice free.
    if bp == b and op == o:
        return out_p
    return out_p[:b, :o]


def dpp_model_forward(x, w1, b1, w2, b2, **kwargs):
    """One-shot convenience wrapper (reprepares params every call)."""
    return dpp_forward(x, prepare_params(w1, b1, w2, b2), **kwargs)


def reference_forward_f32(x, w1, b1, w2, b2):
    h = jnp.maximum(x @ w1 + b1, 0.0)
    return h @ w2 + b2


def reference_forward_bf16(x, w1, b1, w2, b2):
    # Mirrors the kernel's precision: bf16 MXU operands, f32 accumulation.
    bf16 = jnp.bfloat16
    h = jnp.dot(x.astype(bf16), w1.astype(bf16),
                preferred_element_type=jnp.float32) + b1
    h = jnp.maximum(h, 0.0)
    return jnp.dot(h.astype(bf16), w2.astype(bf16),
                   preferred_element_type=jnp.float32) + b2


if __name__ == "__main__":
    # Small shapes consistent with the module:
    #   batch=22, input_size=32, hidden_size_dpp=32, output_size=16
    # (batch chosen non-multiple of 8 to exercise batch padding; the
    #  megacore rule forces a multi-step grid even at this small scale).
    B, D_in, H, O = 22, 32, 32, 16

    key = jax.random.PRNGKey(0)
    kx, kw1, kb1, kw2, kb2 = jax.random.split(key, 5)

    x = jax.random.normal(kx, (B, D_in), dtype=jnp.float32)

    # Deterministic parameter init (uniform, PyTorch-Linear-like scale).
    lim1 = 1.0 / jnp.sqrt(D_in)
    w1 = jax.random.uniform(kw1, (D_in, H), minval=-lim1, maxval=lim1,
                            dtype=jnp.float32)
    b1 = jax.random.uniform(kb1, (H,), minval=-lim1, maxval=lim1,
                            dtype=jnp.float32)
    lim2 = 1.0 / jnp.sqrt(H)
    w2 = jax.random.uniform(kw2, (H, O), minval=-lim2, maxval=lim2,
                            dtype=jnp.float32)
    b2 = jax.random.uniform(kb2, (O,), minval=-lim2, maxval=lim2,
                            dtype=jnp.float32)

    # One-time weight repack at "model init"; reused across forwards.
    params = prepare_params(w1, b1, w2, b2)

    out = dpp_forward(x, params)
    out = jax.block_until_ready(out)

    assert out.shape == (B, O), out.shape

    # Exact-precision check (same bf16-operand / f32-accumulate math).
    ref_bf16 = reference_forward_bf16(x, w1, b1, w2, b2)
    assert jnp.allclose(out, ref_bf16, atol=1e-3, rtol=1e-3), \
        "mismatch vs bf16 reference"

    # Sanity check against the full-f32 reference (bf16 rounding tolerance).
    ref_f32 = reference_forward_f32(x, w1, b1, w2, b2)
    assert jnp.allclose(out, ref_f32, atol=1e-1, rtol=1e-1), \
        "mismatch vs f32 reference"

    print("KERNEL_OK")
</pallas_src>

<mosaic_0001>
module attributes {stable_mosaic.version = 11 : i64} {
  func.func @_dpp_fused_kernel(%arg0: i32, %arg1: memref<16x32xf32, #tpu.memory_space<vmem>>, %arg2: memref<32x128xbf16, #tpu.memory_space<vmem>>, %arg3: memref<1x128xf32, #tpu.memory_space<vmem>>, %arg4: memref<128x128xbf16, #tpu.memory_space<vmem>>, %arg5: memref<1x128xf32, #tpu.memory_space<vmem>>, %arg6: memref<16x128xf32, #tpu.memory_space<vmem>>) attributes {dimension_semantics = [#tpu.dimension_semantics<parallel>], iteration_bounds = array<i64: 2>, scalar_prefetch = 0 : i64, scratch_operands = 0 : i64, tpu.core_type = #tpu.core_type<tc>, window_params = [{transform_indices = @transform_0, window_bounds = array<i64: 16, 32>}, {pipeline_mode = #tpu.pipeline_mode<synchronous>, transform_indices = @transform_1, window_bounds = array<i64: 32, 128>}, {pipeline_mode = #tpu.pipeline_mode<synchronous>, transform_indices = @transform_2, window_bounds = array<i64: 1, 128>}, {pipeline_mode = #tpu.pipeline_mode<synchronous>, transform_indices = @transform_3, window_bounds = array<i64: 128, 128>}, {pipeline_mode = #tpu.pipeline_mode<synchronous>, transform_indices = @transform_4, window_bounds = array<i64: 1, 128>}, {transform_indices = @transform_5, window_bounds = array<i64: 16, 128>}]} {
    %c0 = arith.constant 0 : index
    %c0_0 = arith.constant 0 : index
    %0 = vector.load %arg1[%c0, %c0_0] : memref<16x32xf32, #tpu.memory_space<vmem>>, vector<16x32xf32>
    %1 = arith.truncf %0 : vector<16x32xf32> to vector<16x32xbf16>
    %c0_1 = arith.constant 0 : index
    %c0_2 = arith.constant 0 : index
    %2 = vector.load %arg2[%c0_1, %c0_2] : memref<32x128xbf16, #tpu.memory_space<vmem>>, vector<32x128xbf16>
    %cst = arith.constant dense<0.000000e+00> : vector<16x128xf32>
    %3 = tpu.matmul %1, %2, %cst {dimension_numbers = #tpu.dot_dimension_numbers<[1], [0], [0], [1], [0, 0, 1, 1], [], []>} : vector<16x32xbf16>, vector<32x128xbf16>, vector<16x128xf32> -> vector<16x128xf32>
    %c0_3 = arith.constant 0 : index
    %c0_4 = arith.constant 0 : index
    %4 = vector.load %arg3[%c0_3, %c0_4] : memref<1x128xf32, #tpu.memory_space<vmem>>, vector<1x128xf32>
    %5 = vector.broadcast %4 : vector<1x128xf32> to vector<16x128xf32>
    %6 = arith.addf %3, %5 : vector<16x128xf32>
    %cst_5 = arith.constant 0.000000e+00 : f32
    %7 = vector.broadcast %cst_5 : f32 to vector<16x128xf32>
    %8 = arith.maximumf %6, %7 : vector<16x128xf32>
    %9 = arith.truncf %8 : vector<16x128xf32> to vector<16x128xbf16>
    %c0_6 = arith.constant 0 : index
    %c0_7 = arith.constant 0 : index
    %10 = vector.load %arg4[%c0_6, %c0_7] : memref<128x128xbf16, #tpu.memory_space<vmem>>, vector<128x128xbf16>
    %cst_8 = arith.constant dense<0.000000e+00> : vector<16x128xf32>
    %11 = tpu.matmul %9, %10, %cst_8 {dimension_numbers = #tpu.dot_dimension_numbers<[1], [0], [0], [1], [0, 0, 1, 1], [], []>} : vector<16x128xbf16>, vector<128x128xbf16>, vector<16x128xf32> -> vector<16x128xf32>
    %c0_9 = arith.constant 0 : index
    %c0_10 = arith.constant 0 : index
    %12 = vector.load %arg5[%c0_9, %c0_10] : memref<1x128xf32, #tpu.memory_space<vmem>>, vector<1x128xf32>
    %13 = vector.broadcast %12 : vector<1x128xf32> to vector<16x128xf32>
    %14 = arith.addf %11, %13 : vector<16x128xf32>
    %c0_11 = arith.constant 0 : index
    %c0_12 = arith.constant 0 : index
    %15 = vector.load %arg6[%c0_11, %c0_12] : memref<16x128xf32, #tpu.memory_space<vmem>>, vector<16x128xf32>
    tpu.vector_store %arg6[%c0_11, %c0_12], %14 {strides = array<i32>} : memref<16x128xf32, #tpu.memory_space<vmem>>, vector<16x128xf32>,
    return
  }
  func.func @transform_0(%arg0: i32) -> (i32, i32) {
    %c0_i32 = arith.constant 0 : i32
    %c0_i32_0 = arith.constant 0 : i32
    return %arg0, %c0_i32 : i32, i32
  }
  func.func @transform_1(%arg0: i32) -> (i32, i32) {
    %c0_i32 = arith.constant 0 : i32
    %c0_i32_0 = arith.constant 0 : i32
    %c0_i32_1 = arith.constant 0 : i32
    return %c0_i32, %c0_i32_0 : i32, i32
  }
  func.func @transform_2(%arg0: i32) -> (i32, i32) {
    %c0_i32 = arith.constant 0 : i32
    %c0_i32_0 = arith.constant 0 : i32
    %c0_i32_1 = arith.constant 0 : i32
    return %c0_i32, %c0_i32_0 : i32, i32
  }
  func.func @transform_3(%arg0: i32) -> (i32, i32) {
    %c0_i32 = arith.constant 0 : i32
    %c0_i32_0 = arith.constant 0 : i32
    %c0_i32_1 = arith.constant 0 : i32
    return %c0_i32, %c0_i32_0 : i32, i32
  }
  func.func @transform_4(%arg0: i32) -> (i32, i32) {
    %c0_i32 = arith.constant 0 : i32
    %c0_i32_0 = arith.constant 0 : i32
    %c0_i32_1 = arith.constant 0 : i32
    return %c0_i32, %c0_i32_0 : i32, i32
  }
  func.func @transform_5(%arg0: i32) -> (i32, i32) {
    %c0_i32 = arith.constant 0 : i32
    %c0_i32_0 = arith.constant 0 : i32
    return %arg0, %c0_i32 : i32, i32
  }
}

module attributes {stable_mosaic.version = 11 : i64} {
  func.func @_dpp_fused_kernel(%arg0: i32, %arg1: memref<16x32xf32, #tpu.memory_space<vmem>>, %arg2: memref<32x128xbf16, #tpu.memory_space<vmem>>, %arg3: memref<1x128xf32, #tpu.memory_space<vmem>>, %arg4: memref<128x128xbf16, #tpu.memory_space<vmem>>, %arg5: memref<1x128xf32, #tpu.memory_space<vmem>>, %arg6: memref<16x128xf32, #tpu.memory_space<vmem>>) attributes {dimension_semantics = [#tpu.dimension_semantics<parallel>], iteration_bounds = array<i64: 2>, scalar_prefetch = 0 : i64, scratch_operands = 0 : i64, tpu.core_type = #tpu.core_type<tc>, window_params = [{transform_indices = @transform_0, window_bounds = array<i64: 16, 32>}, {pipeline_mode = #tpu.pipeline_mode<synchronous>, transform_indices = @transform_1, window_bounds = array<i64: 32, 128>}, {pipeline_mode = #tpu.pipeline_mode<synchronous>, transform_indices = @transform_2, window_bounds = array<i64: 1, 128>}, {pipeline_mode = #tpu.pipeline_mode<synchronous>, transform_indices = @transform_3, window_bounds = array<i64: 128, 128>}, {pipeline_mode = #tpu.pipeline_mode<synchronous>, transform_indices = @transform_4, window_bounds = array<i64: 1, 128>}, {transform_indices = @transform_5, window_bounds = array<i64: 16, 128>}]} {
    %c0 = arith.constant 0 : index
    %c0_0 = arith.constant 0 : index
    %0 = vector.load %arg1[%c0, %c0_0] : memref<16x32xf32, #tpu.memory_space<vmem>>, vector<16x32xf32>
    %1 = arith.truncf %0 : vector<16x32xf32> to vector<16x32xbf16>
    %c0_1 = arith.constant 0 : index
    %c0_2 = arith.constant 0 : index
    %2 = vector.load %arg2[%c0_1, %c0_2] : memref<32x128xbf16, #tpu.memory_space<vmem>>, vector<32x128xbf16>
    %cst = arith.constant dense<0.000000e+00> : vector<16x128xf32>
    %3 = tpu.matmul %1, %2, %cst {dimension_numbers = #tpu.dot_dimension_numbers<[1], [0], [0], [1], [0, 0, 1, 1], [], []>} : vector<16x32xbf16>, vector<32x128xbf16>, vector<16x128xf32> -> vector<16x128xf32>
    %c0_3 = arith.constant 0 : index
    %c0_4 = arith.constant 0 : index
    %4 = vector.load %arg3[%c0_3, %c0_4] : memref<1x128xf32, #tpu.memory_space<vmem>>, vector<1x128xf32>
    %5 = vector.broadcast %4 : vector<1x128xf32> to vector<16x128xf32>
    %6 = arith.addf %3, %5 : vector<16x128xf32>
    %cst_5 = arith.constant 0.000000e+00 : f32
    %7 = vector.broadcast %cst_5 : f32 to vector<16x128xf32>
    %8 = arith.maximumf %6, %7 : vector<16x128xf32>
    %9 = arith.truncf %8 : vector<16x128xf32> to vector<16x128xbf16>
    %c0_6 = arith.constant 0 : index
    %c0_7 = arith.constant 0 : index
    %10 = vector.load %arg4[%c0_6, %c0_7] : memref<128x128xbf16, #tpu.memory_space<vmem>>, vector<128x128xbf16>
    %cst_8 = arith.constant dense<0.000000e+00> : vector<16x128xf32>
    %11 = tpu.matmul %9, %10, %cst_8 {dimension_numbers = #tpu.dot_dimension_numbers<[1], [0], [0], [1], [0, 0, 1, 1], [], []>} : vector<16x128xbf16>, vector<128x128xbf16>, vector<16x128xf32> -> vector<16x128xf32>
    %c0_9 = arith.constant 0 : index
    %c0_10 = arith.constant 0 : index
    %12 = vector.load %arg5[%c0_9, %c0_10] : memref<1x128xf32, #tpu.memory_space<vmem>>, vector<1x128xf32>
    %13 = vector.broadcast %12 : vector<1x128xf32> to vector<16x128xf32>
    %14 = arith.addf %11, %13 : vector<16x128xf32>
    %c0_11 = arith.constant 0 : index
    %c0_12 = arith.constant 0 : index
    %15 = vector.load %arg6[%c0_11, %c0_12] : memref<16x128xf32, #tpu.memory_space<vmem>>, vector<16x128xf32>
    tpu.vector_store %arg6[%c0_11, %c0_12], %14 {strides = array<i32>} : memref<16x128xf32, #tpu.memory_space<vmem>>, vector<16x128xf32>,
    return
  }
  func.func @transform_0(%arg0: i32) -> (i32, i32) {
    %c0_i32 = arith.constant 0 : i32
    %c0_i32_0 = arith.constant 0 : i32
    return %arg0, %c0_i32 : i32, i32
  }
  func.func @transform_1(%arg0: i32) -> (i32, i32) {
    %c0_i32 = arith.constant 0 : i32
    %c0_i32_0 = arith.constant 0 : i32
    %c0_i32_1 = arith.constant 0 : i32
    return %c0_i32, %c0_i32_0 : i32, i32
  }
  func.func @transform_2(%arg0: i32) -> (i32, i32) {
    %c0_i32 = arith.constant 0 : i32
    %c0_i32_0 = arith.constant 0 : i32
    %c0_i32_1 = arith.constant 0 : i32
    return %c0_i32, %c0_i32_0 : i32, i32
  }
  func.func @transform_3(%arg0: i32) -> (i32, i32) {
    %c0_i32 = arith.constant 0 : i32
    %c0_i32_0 = arith.constant 0 : i32
    %c0_i32_1 = arith.constant 0 : i32
    return %c0_i32, %c0_i32_0 : i32, i32
  }
  func.func @transform_4(%arg0: i32) -> (i32, i32) {
    %c0_i32 = arith.constant 0 : i32
    %c0_i32_0 = arith.constant 0 : i32
    %c0_i32_1 = arith.constant 0 : i32
    return %c0_i32, %c0_i32_0 : i32, i32
  }
  func.func @transform_5(%arg0: i32) -> (i32, i32) {
    %c0_i32 = arith.constant 0 : i32
    %c0_i32_0 = arith.constant 0 : i32
    return %arg0, %c0_i32 : i32, i32
  }
}

</mosaic_0001>

<bundles_post_ra>
// kernel: tpu_custom_call.1
= control target key start
LH: loop header
LB: loop body
LE: loop exit
PB: predicated region body
PF: predicated region fallthrough
CT: control target
= control target key end

     0   :  { %10 = vsyncpa [#allocation3], 0  ;;  %s1171_s0 = inlined_call_operand.hbm [shape: f32[32,32], index: 0, kind: input, shape index: {}]   ;;  %s1172_s1 = inlined_call_operand.hbm [shape: bf16[32,128], index: 1, kind: input, shape index: {}]   ;;  %s1173_s2 = inlined_call_operand.vmem [shape: f32[1,128], index: 2, kind: input, shape index: {}]   ;;  %s1174_s3 = inlined_call_operand.hbm [shape: bf16[128,128], index: 3, kind: input, shape index: {}]   ;;  %s1175_s4 = inlined_call_operand.vmem [shape: f32[1,128], index: 4, kind: input, shape index: {}]   ;;  %s1176_s5 = inlined_call_operand.hbm [shape: f32[32,128], index: 5, kind: output, shape index: {}]  }
   0x1   :  { %12 = vsyncpa [#allocation3 + $0x1], 0 }
   0x2   :  { %13 = vsyncpa [#allocation6], 0 }
   0x3   :  { %14 = vsyncpa [#allocation4], 0 }
   0x4   :  { %16 = vsyncpa [#allocation4 + $0x1], 0  ;;  %s927_s18 = smov 0   ;;  %s929_s19 = smov 0  }
   0x5   :  { %s931_s20 = smov 0   ;;  %s933_s21 = smov 0  }
   0x6 LB: > { %s948_s22 = sadd.s32 4294967295, %s883_s21   ;;  %s569_s23 = sadd.s32 4294967294, %s883_s21   ;;  %s883_s21 = sphi %s933_s21, %s1196_s21   ;;  %s879_s20 = sphi %s931_s20, %s1195_s20   ;;  %s875_s19 = sphi %s929_s19, %s1194_s19   ;;  %s871_s18 = sphi %s927_s18, %s1193_s18  }
   0x7   : > { %p42_p0 = scmp.ne.s32.totalorder %s875_s19, %s871_s18  ;;  %p1177_p1 = scmp.eq.s32.totalorder %s948_s22, 0 }
   0x8   : > { %p156_p3 = scmp.eq.s32.totalorder %s569_s23, 1  ;;  %p570_p5 = scmp.ge.s32.totalorder %s883_s21, 1 }
   0x9   : > { %p957_p4 = por %p1177_p1, %p42_p0  ;;  %p163_p7 = scmp.lt.s32.totalorder %s883_s21, 3 }
   0xa   : > { %p962_p6 = por %p156_p3, %p42_p0  ;;  %s885_s27 = smov [#allocation5]  }
   0xb   : > { %s1180_s24 = scalar_select %p957_p4, 1, 0 }
   0xc   : > { %s1181_s25 = scalar_select %p962_p6, 1, 0 }
   0xd   : > { %p967_p8 = pnand %p570_p5, %p163_p7  ;;  %s175_s28 = sshll.u32 %s885_s27, 4  ;;  %s971_s28 = int_to_ptr.vmem [resolvable:$true] %s175_s28 }
   0xe   : > { %s886_s30 = smov [#allocation7]   ;;  %s727_s9 = scalar_lea.hbm %s1172_s1, 256 }
   0xf   : > { %p654_p9 = pneg %p967_p8  ;;  %s191_s6 = sshll.u32 %s886_s30, 4  ;;  %s982_s6 = int_to_ptr.vmem [resolvable:$true] %s191_s6 }
  0x10   : > { %p728_p12 = scmp.ne.s32.totalorder %s1172_s1, %s727_s9  ;;  %p734_p5 = scmp.lt.u32.totalorder %s727_s9, %s1172_s1 }
  0x11   : > { %p978_p11 = pnand %p654_p9, %p1177_p1 }
  0x13   : > { %p729_p13 = pneg %p978_p11 }
  0x15   : > { %p730_p0 = pnand %p729_p13, %p728_p12 }
  0x17   : > { %p731_p3 = pneg %p730_p0 }
  0x19   : > { %p736_p7 = pnand %p734_p5, %p731_p3 }
  0x1b   : > { %739 = shalt.err (!%p736_p7)
}
  0x1c   : > { %s740_s14 = scalar_lea.vmem %s971_s28, 256  ;;  %p748_p2 = scmp.lt.s32.totalorder %s971_s28, %s971_s28 }
  0x1d   : > { %p741_p9 = scmp.ne.s32.totalorder %s971_s28, %s740_s14  ;;  %p749_p12 = scmp.lt.s32.totalorder %s740_s14, %s740_s14 }
  0x1f   : > { %p743_p10 = pnand %p741_p9, %p729_p13  ;;  %p750_p0 = por %p749_p12, %p748_p2 }
  0x21   : > { %p744_p1 = pneg %p743_p10 }
  0x23   : > { %p751_p6 = pnand %p750_p0, %p744_p1 }
  0x25   : > { %754 = shalt.err (!%p751_p6)
}
  0x26   : > { %s887_s15 = smov 64   ;;  %s888_s16 = smov 4  }
  0x27   : > { %657 = dma.hbm_to_vmem [thread:$0]  (!%p978_p11), %s1172_s1, 256, %s971_s28, [#allocation6], %s887_s15, %s887_s15, %s888_s16  }
  0x28   : > { %s755_s7 = scalar_lea.hbm %s1174_s3, 1024 }
  0x29   : > { %p756_p2 = scmp.ne.s32.totalorder %s1174_s3, %s755_s7  ;;  %p762_p10 = scmp.lt.u32.totalorder %s755_s7, %s1174_s3 }
  0x2b   : > { %p758_p1 = pnand %p756_p2, %p729_p13 }
  0x2d   : > { %p759_p6 = pneg %p758_p1 }
  0x2f   : > { %p764_p3 = pnand %p762_p10, %p759_p6 }
  0x31   : > { %767 = shalt.err (!%p764_p3)
}
  0x32   : > { %s768_s28 = scalar_lea.vmem %s982_s6, 1024  ;;  %p776_p12 = scmp.lt.s32.totalorder %s982_s6, %s982_s6 }
  0x33   : > { %p769_p5 = scmp.ne.s32.totalorder %s982_s6, %s768_s28  ;;  %p777_p0 = scmp.lt.s32.totalorder %s768_s28, %s768_s28 }
  0x35   : > { %p771_p7 = pnand %p769_p5, %p729_p13  ;;  %p778_p2 = por %p777_p0, %p776_p12 }
  0x37   : > { %p772_p9 = pneg %p771_p7 }
  0x39   : > { %p779_p1 = pnand %p778_p2, %p772_p9 }
  0x3b   : > { %782 = shalt.err (!%p779_p1)
}
  0x3c   : > { %660 = dma.hbm_to_vmem [thread:$0]  (!%p978_p11), %s1174_s3, 1024, %s982_s6, [#allocation6], %s887_s15, %s887_s15, %s888_s16  }
  0x3d   : > { %s1037_s14 = sadd.s32 1, %s883_s21   ;;  %s29_s29 = sadd.s32 1, %s879_s20 }
  0x3e   : > { %s26_s17 = ssub.s32 %s883_s21, %s1037_s14  ;;  %p36_p13 = scmp.ne.s32.totalorder %s879_s20, %s875_s19 }
  0x3f   : > { %p27_p6 = scmp.eq.s32.totalorder %s26_s17, 0  ;;  %p37_p10 = scmp.eq.s32.totalorder %s883_s21, 0 }
  0x40   : > { %p1184_p3 = scmp.eq.s32.totalorder %s948_s22, 1  ;;  %p671_p7 = scmp.lt.s32.totalorder %s883_s21, 2 }
  0x41   : > { %s1053_s27 = scalar_select %p27_p6, %s879_s20, %s29_s29  }
  0x42   : > { %p1047_p5 = por %p1184_p3, %p36_p13  ;;  %p38_p9 = por %p37_p10, %p36_p13 }
  0x43   : > { %s208_s30 = sand.u32 1, %s879_s20   ;;  %s600_s6 = sshll.u32 %s883_s21, 8 }
  0x44   : > { %s1185_s23 = scalar_select %p1047_p5, 1, 0 }
  0x45   : > { %s574_s7 = sshll.u32 %s208_s30, 4  ;;  %s1060_s8 = scalar_lea.hbm %s1171_s0, %s600_s6 }
  0x46   : > { %s212_s9 = scalar_lea.vmem [#allocation2], %s574_s7  ;;  %p1064_p11 = pnand %p671_p7, %p38_p9 }
  0x47   : > { %s219_s10 = sshll.u32 %s212_s9, 4  ;;  %s1068_s28 = scalar_lea.sflag [#allocation3], %s208_s30  ;;  %s1062_s10 = int_to_ptr.vmem [resolvable:$true] %s219_s10 }
  0x48   : > { %s783_s12 = scalar_lea.hbm %s1060_s8, 256  ;;  %p785_p0 = pneg %p1064_p11 }
  0x49   : > { %p784_p12 = scmp.ne.s32.totalorder %s1060_s8, %s783_s12  ;;  %s788_s17 = scalar_lea.hbm %s1171_s0, 512 }
  0x4a   : > { %p789_p13 = scmp.lt.u32.totalorder %s1060_s8, %s1171_s0  ;;  %p790_p6 = scmp.lt.u32.totalorder %s788_s17, %s783_s12 }
  0x4b   : > { %p786_p2 = pnand %p785_p0, %p784_p12  ;;  %p792_p3 = scmp.lt.u32.totalorder %s783_s12, %s1060_s8 }
  0x4c   : > { %p791_p10 = por %p790_p6, %p789_p13 }
  0x4d   : > { %p787_p1 = pneg %p786_p2 }
  0x4e   : > { %p793_p7 = por %p792_p3, %p791_p10 }
  0x50   : > { %p794_p9 = pnand %p793_p7, %p787_p1 }
  0x52   : > { %797 = shalt.err (!%p794_p9)
}
  0x53   : > { %s798_s30 = scalar_lea.vmem %s1062_s10, 256  ;;  %s889_s15 = smov [#allocation2]  }
  0x54   : > { %p799_p12 = scmp.ne.s32.totalorder %s1062_s10, %s798_s30  ;;  %s803_s16 = sshll.u32 %s889_s15, 4  ;;  %s804_s16 = int_to_ptr.vmem [resolvable:$false] %s803_s16 }
  0x55   : > { %s805_s9 = scalar_lea.vmem %s804_s16, 512  ;;  %p806_p4 = scmp.lt.s32.totalorder %s1062_s10, %s804_s16 }
  0x56   : > { %p801_p2 = pnand %p799_p12, %p785_p0  ;;  %p807_p13 = scmp.lt.s32.totalorder %s805_s9, %s798_s30 }
  0x58   : > { %p802_p5 = pneg %p801_p2  ;;  %p808_p6 = por %p807_p13, %p806_p4 }
  0x5a   : > { %p809_p10 = pnand %p808_p6, %p802_p5 }
  0x5c   : > { %812 = shalt.err (!%p809_p10)
}
  0x5d   : > { %s890_s12 = smov 128   ;;  %s891_s13 = smov 8  }
  0x5e   : > { %664 = dma.hbm_to_vmem [thread:$0]  (!%p1064_p11), %s1060_s8, 256, %s1062_s10, %s1068_s28, %s890_s12, %s890_s12, %s891_s13  }
  0x5f   : > { %231 = sbr.rel (%p967_p8) target bundleno = 567 (0x237), region = 40  ;;  %s1099_s29 = sand.u32 (!%p967_p8), 1, %s875_s19  }
  0x60   : > { %s578_s17 = sshll.u32 (!%p967_p8), %s1099_s29, 4  ;;  %s234_s7 = scalar_lea.sflag (!%p967_p8), [#allocation3], %s1099_s29 }
  0x61   : > { %s237_s6 = scalar_lea.vmem (!%p967_p8), [#allocation2], %s578_s17  ;;  %p1187_p4 = scmp.ne.s32.totalorder (!%p967_p8), %s1180_s24, 0 }
  0x66   : > { %858 = dma.done.wait (%p1187_p4), %s234_s7, 256  }
  0x67   : > { %860 = vsyncadd (%p1187_p4), %s234_s7, 4294967040  ;;  %p1188_p5 = scmp.eq.s32.totalorder %s948_s22, 0 }
  0x69   : > { %862 = dma.done.wait (%p1188_p5), [#allocation6], 1280   ;;  %p1189_p8 = pmov %p1188_p5 }
  0x6a   : > { %v892_v0 = vmov 0.0   ;;  %vm893_vm0 = vmmov 0   ;;  %v717_v1 = vld [vmem:[#allocation5] sm:$0xff]   ;;  %v718_v2 = vld [vmem:[#allocation5 + $0x8] sm:$0xff]   ;;  %v719_v5 = vld [vmem:[#allocation7] sm:$0xff]   ;;  %vm301_vm1 = vcmask 261120  }
  0x6b   : > { %864 = vsyncadd (%p1189_p8), [#allocation6], 4294966016  ;;  %614 = vmatprep.subr.bf16.mxu0 %v892_v0  ;;  %618 = vmatprep.mubr.msk.bf16.mxu0 %vm893_vm0, %v892_v0  ;;  %v275_v3 = vld [vmem:[%s237_s6] sm:$0xff]  ;;  %v276_v4 = vld [vmem:[%s237_s6 + $0x8] sm:$0xff]  ;;  %s271_s11 = scalar_lea.vmem [#allocation8], %s578_s17  ;;  %s601_s30 = sshll.u32 %s948_s22, 8 }
  0x6c   : > { %622 = vmatprep.subr.bf16.mxu1 %v892_v0  ;;  %638 = vmatprep.mubr.msk.bf16.mxu1 %vm893_vm0, %v892_v0  ;;  %v277_v6 = vpack.c.bf16 %v276_v4, %v275_v3  ;;  %v720_v7 = vld [vmem:[#allocation7 + $0x8] sm:$0xff]   ;;  %v721_v8 = vld [vmem:[#allocation7 + $0x10] sm:$0xff]   ;;  %v722_v9 = vld [vmem:[#allocation7 + $0x18] sm:$0xff]   ;;  %s477_s28 = sshll.u32 %s271_s11, 4  ;;  %s1127_s9 = scalar_lea.hbm %s1176_s5, %s601_s30  ;;  %s1122_s28 = int_to_ptr.vmem [resolvable:$true] %s477_s28 }
  0x6d   : > { %615 = vmatpush3.bf16.msra.mxu0 %v717_v1  ;;  %623 = vmatpush3.bf16.msra.mxu1 %v719_v5  ;;  %v723_v10 = vld [vmem:[#allocation7 + $0x20] sm:$0xff]   ;;  %v724_v11 = vld [vmem:[#allocation7 + $0x28] sm:$0xff]   ;;  %v725_v12 = vld [vmem:[#allocation7 + $0x30] sm:$0xff]   ;;  %s464_s12 = scalar_lea.sflag [#allocation4], %s1099_s29  ;;  %s813_s22 = scalar_lea.vmem %s1122_s28, 256 }
  0x6e   : > { %616 = vmatprep.subr.bf16.mxu0 %v892_v0  ;;  %624 = vmatprep.subr.bf16.mxu1 %v892_v0  ;;  %v726_v13 = vld [vmem:[#allocation7 + $0x38] sm:$0xff]   ;;  %v582_v14 = vld [vmem:[%s1173_s2] ss:$0 sm:$0xff]  ;;  %p814_p11 = scmp.ne.s32.totalorder %s1122_s28, %s813_s22  ;;  %p1190_p0 = scmp.ne.s32.totalorder %s1185_s23, 0 }
  0x6f   : > { %v586_v24 = vld [vmem:[%s1175_s4] ss:$0 sm:$0xff]  ;;  %s894_s13 = smov [#allocation8]  }
  0x70   : > { %p815_p1 = pnand %p814_p11, %p1190_p0  ;;  %s817_s17 = sshll.u32 %s894_s13, 4  ;;  %s818_s17 = int_to_ptr.vmem [resolvable:$false] %s817_s17 }
  0x71   : > { %617 = vmatpush3.bf16.msra.mxu0 %v718_v2  ;;  %625 = vmatpush3.bf16.msra.mxu1 %v720_v7  ;;  %s819_s7 = scalar_lea.vmem %s818_s17, 512  ;;  %p820_p7 = scmp.lt.s32.totalorder %s1122_s28, %s818_s17 }
  0x72   : > { %626 = vmatprep.subr.bf16.mxu1 %v892_v0  ;;  %p816_p3 = pneg %p815_p1  ;;  %p821_p9 = scmp.lt.s32.totalorder %s819_s7, %s813_s22 }
  0x74   : > { %619 = vmatmul.mubr.msk.bf16.vlgmr.msra.gmra.mrb[0].mxu0 %vm301_vm1, %v277_v6  ;;  %p822_p12 = por %p821_p9, %p820_p7 }
  0x75   : > { %627 = vmatpush3.bf16.msra.mxu1 %v721_v8 }
  0x76   : > { %628 = vmatprep.subr.bf16.mxu1 %v892_v0  ;;  %p823_p2 = pnand %p822_p12, %p816_p3 }
  0x79   : > { %629 = vmatpush3.bf16.msra.mxu1 %v722_v9 }
  0x7a   : > { %630 = vmatprep.subr.bf16.mxu1 %v892_v0 }
  0x7d   : > { %631 = vmatpush3.bf16.msra.mxu1 %v723_v10 }
  0x7e   : > { %632 = vmatprep.subr.bf16.mxu1 %v892_v0 }
  0x81   : > { %633 = vmatpush3.bf16.msra.mxu1 %v724_v11 }
  0x82   : > { %634 = vmatprep.subr.bf16.mxu1 %v892_v0 }
  0x85   : > { %635 = vmatpush3.bf16.msra.mxu1 %v725_v12 }
  0x86   : > { %636 = vmatprep.subr.bf16.mxu1 %v892_v0 }
  0x89   : > { %637 = vmatpush3.bf16.msra.mxu1 %v726_v13 }
 0x147   : > { %v339_v15 = vpop.f32.mrb[0].mxu0 }
 0x148   : > { %v340_v16 = vadd.f32 %v582_v14, %v339_v15  ;;  %v620_v17 = vpop.f32.mrb[1].mxu0 }
 0x149   : > { %v342_v18 = vpop.f32.mrb[2].mxu0 }
 0x14a   : > { %v343_v19 = vadd.f32 %v582_v14, %v342_v18  ;;  %v621_v20 = vpop.f32.mrb[3].mxu0  ;;  %v346_v21 = vmax.f32 %v340_v16, 0.0 }
 0x14c   : > { %v347_v22 = vmax.f32 %v343_v19, 0.0 }
 0x14e   : > { %v348_v23 = vpack.c.bf16 %v347_v22, %v346_v21 }
 0x150   : > { %639 = vmatmul.mubr.bf16.vlgmr.msra.gmra.mrb[0].mxu1 %v348_v23 }
 0x223   : > { %v454_v25 = vpop.f32.mrb[0].mxu1 }
 0x224   : > { %v455_v26 = vadd.f32 %v586_v24, %v454_v25  ;;  %v640_v27 = vpop.f32.mrb[1].mxu1 }
 0x225   : > { %v457_v28 = vpop.f32.mrb[2].mxu1 }
 0x226   : > { %461 = vst [vmem:[%s271_s11] sm:$0xff] %v455_v26  ;;  %v458_v29 = vadd.f32 %v586_v24, %v457_v28  ;;  %v641_v30 = vpop.f32.mrb[3].mxu1 }
 0x228   : > { %462 = vst [vmem:[%s271_s11 + $0x8] sm:$0xff] %v458_v29 }
 0x229   : > { %826 = shalt.err (!%p823_p2)
}
 0x22a   : > { %s827_s6 = scalar_lea.hbm %s1127_s9, 256  ;;  %s831_s8 = scalar_lea.hbm %s1176_s5, 512 }
 0x22b   : > { %p828_p13 = scmp.ne.s32.totalorder %s1127_s9, %s827_s6  ;;  %p832_p4 = scmp.lt.u32.totalorder %s1127_s9, %s1176_s5 }
 0x22c   : > { %p833_p5 = scmp.lt.u32.totalorder %s831_s8, %s827_s6  ;;  %p835_p11 = scmp.lt.u32.totalorder %s827_s6, %s1127_s9 }
 0x22d   : > { %p829_p6 = pnand %p828_p13, %p1190_p0 }
 0x22e   : > { %p834_p8 = por %p833_p5, %p832_p4 }
 0x22f   : > { %p830_p10 = pneg %p829_p6 }
 0x230   : > { %p836_p1 = por %p835_p11, %p834_p8 }
 0x232   : > { %p837_p3 = pnand %p836_p1, %p830_p10 }
 0x234   : > { %840 = shalt.err (!%p837_p3)
}
 0x235   : > { %s895_s30 = smov 128   ;;  %s896_s15 = smov 8  }
 0x236   : > { %652 = dma.vmem_to_hbm [thread:$0]  (%p1190_p0), %s1122_s28, 256, %s1127_s9, %s464_s12, %s895_s30, %s895_s30, %s896_s15  }
 0x237 PF: > { %s492_s16 = sand.u32 1, %s871_s18   ;;  %p1191_p7 = scmp.ne.s32.totalorder %s1181_s25, 0 }
 0x238   : > { %p1192_p9 = scmp.ge.s32.totalorder %s883_s21, 2  ;;  %s493_s22 = scalar_lea.sflag [#allocation4], %s492_s16 }
 0x23a   : > { %p666_p12 = pnand %p1192_p9, %p1191_p7 }
 0x23c   : > { %866 = dma.done.wait (!%p666_p12), %s493_s22, 256  }
 0x23d   : > { %868 = vsyncadd (!%p666_p12), %s493_s22, 4294967040  ;;  %p19_p2 = scmp.ge.s32.totalorder %s1037_s14, 4   ;;  %s1193_s18 = smov %s875_s19 }
 0x23e   : > { %s1194_s19 = smov %s879_s20  ;;  %s1195_s20 = smov %s1053_s27 }
 0x23f   : > { %s1196_s21 = smov %s1037_s14  ;;  %21 = sbr.rel (!%p19_p2) target bundleno = 6 (0x6), region = 93 }
 0x246   :  { %498 = vsyncpa [#allocation3], 1 }
 0x247   :  { %500 = vsyncpa [#allocation3 + $0x1], 1 }
 0x248   :  { %501 = vsyncpa [#allocation6], 1 }
 0x249   :  { %502 = vsyncpa [#allocation4], 1 }
 0x24a   :  { %504 = vsyncpa [#allocation4 + $0x1], 1 }

// kernel: tpu_custom_call.1
= control target key start
LH: loop header
LB: loop body
LE: loop exit
PB: predicated region body
PF: predicated region fallthrough
CT: control target
= control target key end

     0   :  { %10 = vsyncpa [#allocation3], 0  ;;  %s1171_s0 = inlined_call_operand.hbm [shape: f32[32,32], index: 0, kind: input, shape index: {}]   ;;  %s1172_s1 = inlined_call_operand.hbm [shape: bf16[32,128], index: 1, kind: input, shape index: {}]   ;;  %s1173_s2 = inlined_call_operand.vmem [shape: f32[1,128], index: 2, kind: input, shape index: {}]   ;;  %s1174_s3 = inlined_call_operand.hbm [shape: bf16[128,128], index: 3, kind: input, shape index: {}]   ;;  %s1175_s4 = inlined_call_operand.vmem [shape: f32[1,128], index: 4, kind: input, shape index: {}]   ;;  %s1176_s5 = inlined_call_operand.hbm [shape: f32[32,128], index: 5, kind: output, shape index: {}]  }
   0x1   :  { %12 = vsyncpa [#allocation3 + $0x1], 0 }
   0x2   :  { %13 = vsyncpa [#allocation6], 0 }
   0x3   :  { %14 = vsyncpa [#allocation4], 0 }
   0x4   :  { %16 = vsyncpa [#allocation4 + $0x1], 0  ;;  %s927_s18 = smov 0   ;;  %s929_s19 = smov 0  }
   0x5   :  { %s931_s20 = smov 0   ;;  %s933_s21 = smov 0  }
   0x6 LB: > { %s948_s22 = sadd.s32 4294967295, %s883_s21   ;;  %s569_s23 = sadd.s32 4294967294, %s883_s21   ;;  %s883_s21 = sphi %s933_s21, %s1196_s21   ;;  %s879_s20 = sphi %s931_s20, %s1195_s20   ;;  %s875_s19 = sphi %s929_s19, %s1194_s19   ;;  %s871_s18 = sphi %s927_s18, %s1193_s18  }
   0x7   : > { %p42_p0 = scmp.ne.s32.totalorder %s875_s19, %s871_s18  ;;  %p1177_p1 = scmp.eq.s32.totalorder %s948_s22, 0 }
   0x8   : > { %p156_p3 = scmp.eq.s32.totalorder %s569_s23, 1  ;;  %p570_p5 = scmp.ge.s32.totalorder %s883_s21, 1 }
   0x9   : > { %p957_p4 = por %p1177_p1, %p42_p0  ;;  %p163_p7 = scmp.lt.s32.totalorder %s883_s21, 3 }
   0xa   : > { %p962_p6 = por %p156_p3, %p42_p0  ;;  %s885_s27 = smov [#allocation5]  }
   0xb   : > { %s1180_s24 = scalar_select %p957_p4, 1, 0 }
   0xc   : > { %s1181_s25 = scalar_select %p962_p6, 1, 0 }
   0xd   : > { %p967_p8 = pnand %p570_p5, %p163_p7  ;;  %s175_s28 = sshll.u32 %s885_s27, 4  ;;  %s971_s28 = int_to_ptr.vmem [resolvable:$true] %s175_s28 }
   0xe   : > { %s886_s30 = smov [#allocation7]   ;;  %s727_s9 = scalar_lea.hbm %s1172_s1, 256 }
   0xf   : > { %p654_p9 = pneg %p967_p8  ;;  %s191_s6 = sshll.u32 %s886_s30, 4  ;;  %s982_s6 = int_to_ptr.vmem [resolvable:$true] %s191_s6 }
  0x10   : > { %p728_p12 = scmp.ne.s32.totalorder %s1172_s1, %s727_s9  ;;  %p734_p5 = scmp.lt.u32.totalorder %s727_s9, %s1172_s1 }
  0x11   : > { %p978_p11 = pnand %p654_p9, %p1177_p1 }
  0x13   : > { %p729_p13 = pneg %p978_p11 }
  0x15   : > { %p730_p0 = pnand %p729_p13, %p728_p12 }
  0x17   : > { %p731_p3 = pneg %p730_p0 }
  0x19   : > { %p736_p7 = pnand %p734_p5, %p731_p3 }
  0x1b   : > { %739 = shalt.err (!%p736_p7)
}
  0x1c   : > { %s740_s14 = scalar_lea.vmem %s971_s28, 256  ;;  %p748_p2 = scmp.lt.s32.totalorder %s971_s28, %s971_s28 }
  0x1d   : > { %p741_p9 = scmp.ne.s32.totalorder %s971_s28, %s740_s14  ;;  %p749_p12 = scmp.lt.s32.totalorder %s740_s14, %s740_s14 }
  0x1f   : > { %p743_p10 = pnand %p741_p9, %p729_p13  ;;  %p750_p0 = por %p749_p12, %p748_p2 }
  0x21   : > { %p744_p1 = pneg %p743_p10 }
  0x23   : > { %p751_p6 = pnand %p750_p0, %p744_p1 }
  0x25   : > { %754 = shalt.err (!%p751_p6)
}
  0x26   : > { %s887_s15 = smov 64   ;;  %s888_s16 = smov 4  }
  0x27   : > { %657 = dma.hbm_to_vmem [thread:$0]  (!%p978_p11), %s1172_s1, 256, %s971_s28, [#allocation6], %s887_s15, %s887_s15, %s888_s16  }
  0x28   : > { %s755_s7 = scalar_lea.hbm %s1174_s3, 1024 }
  0x29   : > { %p756_p2 = scmp.ne.s32.totalorder %s1174_s3, %s755_s7  ;;  %p762_p10 = scmp.lt.u32.totalorder %s755_s7, %s1174_s3 }
  0x2b   : > { %p758_p1 = pnand %p756_p2, %p729_p13 }
  0x2d   : > { %p759_p6 = pneg %p758_p1 }
  0x2f   : > { %p764_p3 = pnand %p762_p10, %p759_p6 }
  0x31   : > { %767 = shalt.err (!%p764_p3)
}
  0x32   : > { %s768_s28 = scalar_lea.vmem %s982_s6, 1024  ;;  %p776_p12 = scmp.lt.s32.totalorder %s982_s6, %s982_s6 }
  0x33   : > { %p769_p5 = scmp.ne.s32.totalorder %s982_s6, %s768_s28  ;;  %p777_p0 = scmp.lt.s32.totalorder %s768_s28, %s768_s28 }
  0x35   : > { %p771_p7 = pnand %p769_p5, %p729_p13  ;;  %p778_p2 = por %p777_p0, %p776_p12 }
  0x37   : > { %p772_p9 = pneg %p771_p7 }
  0x39   : > { %p779_p1 = pnand %p778_p2, %p772_p9 }
  0x3b   : > { %782 = shalt.err (!%p779_p1)
}
  0x3c   : > { %660 = dma.hbm_to_vmem [thread:$0]  (!%p978_p11), %s1174_s3, 1024, %s982_s6, [#allocation6], %s887_s15, %s887_s15, %s888_s16  }
  0x3d   : > { %s1037_s14 = sadd.s32 1, %s883_s21   ;;  %s29_s29 = sadd.s32 1, %s879_s20 }
  0x3e   : > { %s26_s17 = ssub.s32 %s883_s21, %s1037_s14  ;;  %p36_p13 = scmp.ne.s32.totalorder %s879_s20, %s875_s19 }
  0x3f   : > { %p27_p6 = scmp.eq.s32.totalorder %s26_s17, 0  ;;  %p37_p10 = scmp.eq.s32.totalorder %s883_s21, 0 }
  0x40   : > { %p1184_p3 = scmp.eq.s32.totalorder %s948_s22, 1  ;;  %p671_p7 = scmp.lt.s32.totalorder %s883_s21, 2 }
  0x41   : > { %s1053_s27 = scalar_select %p27_p6, %s879_s20, %s29_s29  }
  0x42   : > { %p1047_p5 = por %p1184_p3, %p36_p13  ;;  %p38_p9 = por %p37_p10, %p36_p13 }
  0x43   : > { %s208_s30 = sand.u32 1, %s879_s20   ;;  %s600_s6 = sshll.u32 %s883_s21, 8 }
  0x44   : > { %s1185_s23 = scalar_select %p1047_p5, 1, 0 }
  0x45   : > { %s574_s7 = sshll.u32 %s208_s30, 4  ;;  %s1060_s8 = scalar_lea.hbm %s1171_s0, %s600_s6 }
  0x46   : > { %s212_s9 = scalar_lea.vmem [#allocation2], %s574_s7  ;;  %p1064_p11 = pnand %p671_p7, %p38_p9 }
  0x47   : > { %s219_s10 = sshll.u32 %s212_s9, 4  ;;  %s1068_s28 = scalar_lea.sflag [#allocation3], %s208_s30  ;;  %s1062_s10 = int_to_ptr.vmem [resolvable:$true] %s219_s10 }
  0x48   : > { %s783_s12 = scalar_lea.hbm %s1060_s8, 256  ;;  %p785_p0 = pneg %p1064_p11 }
  0x49   : > { %p784_p12 = scmp.ne.s32.totalorder %s1060_s8, %s783_s12  ;;  %s788_s17 = scalar_lea.hbm %s1171_s0, 512 }
  0x4a   : > { %p789_p13 = scmp.lt.u32.totalorder %s1060_s8, %s1171_s0  ;;  %p790_p6 = scmp.lt.u32.totalorder %s788_s17, %s783_s12 }
  0x4b   : > { %p786_p2 = pnand %p785_p0, %p784_p12  ;;  %p792_p3 = scmp.lt.u32.totalorder %s783_s12, %s1060_s8 }
  0x4c   : > { %p791_p10 = por %p790_p6, %p789_p13 }
  0x4d   : > { %p787_p1 = pneg %p786_p2 }
  0x4e   : > { %p793_p7 = por %p792_p3, %p791_p10 }
  0x50   : > { %p794_p9 = pnand %p793_p7, %p787_p1 }
  0x52   : > { %797 = shalt.err (!%p794_p9)
}
  0x53   : > { %s798_s30 = scalar_lea.vmem %s1062_s10, 256  ;;  %s889_s15 = smov [#allocation2]  }
  0x54   : > { %p799_p12 = scmp.ne.s32.totalorder %s1062_s10, %s798_s30  ;;  %s803_s16 = sshll.u32 %s889_s15, 4  ;;  %s804_s16 = int_to_ptr.vmem [resolvable:$false] %s803_s16 }
  0x55   : > { %s805_s9 = scalar_lea.vmem %s804_s16, 512  ;;  %p806_p4 = scmp.lt.s32.totalorder %s1062_s10, %s804_s16 }
  0x56   : > { %p801_p2 = pnand %p799_p12, %p785_p0  ;;  %p807_p13 = scmp.lt.s32.totalorder %s805_s9, %s798_s30 }
  0x58   : > { %p802_p5 = pneg %p801_p2  ;;  %p808_p6 = por %p807_p13, %p806_p4 }
  0x5a   : > { %p809_p10 = pnand %p808_p6, %p802_p5 }
  0x5c   : > { %812 = shalt.err (!%p809_p10)
}
  0x5d   : > { %s890_s12 = smov 128   ;;  %s891_s13 = smov 8  }
  0x5e   : > { %664 = dma.hbm_to_vmem [thread:$0]  (!%p1064_p11), %s1060_s8, 256, %s1062_s10, %s1068_s28, %s890_s12, %s890_s12, %s891_s13  }
  0x5f   : > { %231 = sbr.rel (%p967_p8) target bundleno = 567 (0x237), region = 40  ;;  %s1099_s29 = sand.u32 (!%p967_p8), 1, %s875_s19  }
  0x60   : > { %s578_s17 = sshll.u32 (!%p967_p8), %s1099_s29, 4  ;;  %s234_s7 = scalar_lea.sflag (!%p967_p8), [#allocation3], %s1099_s29 }
  0x61   : > { %s237_s6 = scalar_lea.vmem (!%p967_p8), [#allocation2], %s578_s17  ;;  %p1187_p4 = scmp.ne.s32.totalorder (!%p967_p8), %s1180_s24, 0 }
  0x66   : > { %858 = dma.done.wait (%p1187_p4), %s234_s7, 256  }
  0x67   : > { %860 = vsyncadd (%p1187_p4), %s234_s7, 4294967040  ;;  %p1188_p5 = scmp.eq.s32.totalorder %s948_s22, 0 }
  0x69   : > { %862 = dma.done.wait (%p1188_p5), [#allocation6], 1280   ;;  %p1189_p8 = pmov %p1188_p5 }
  0x6a   : > { %v892_v0 = vmov 0.0   ;;  %vm893_vm0 = vmmov 0   ;;  %v717_v1 = vld [vmem:[#allocation5] sm:$0xff]   ;;  %v718_v2 = vld [vmem:[#allocation5 + $0x8] sm:$0xff]   ;;  %v719_v5 = vld [vmem:[#allocation7] sm:$0xff]   ;;  %vm301_vm1 = vcmask 261120  }
  0x6b   : > { %864 = vsyncadd (%p1189_p8), [#allocation6], 4294966016  ;;  %614 = vmatprep.subr.bf16.mxu0 %v892_v0  ;;  %618 = vmatprep.mubr.msk.bf16.mxu0 %vm893_vm0, %v892_v0  ;;  %v275_v3 = vld [vmem:[%s237_s6] sm:$0xff]  ;;  %v276_v4 = vld [vmem:[%s237_s6 + $0x8] sm:$0xff]  ;;  %s271_s11 = scalar_lea.vmem [#allocation8], %s578_s17  ;;  %s601_s30 = sshll.u32 %s948_s22, 8 }
  0x6c   : > { %622 = vmatprep.subr.bf16.mxu1 %v892_v0  ;;  %638 = vmatprep.mubr.msk.bf16.mxu1 %vm893_vm0, %v892_v0  ;;  %v277_v6 = vpack.c.bf16 %v276_v4, %v275_v3  ;;  %v720_v7 = vld [vmem:[#allocation7 + $0x8] sm:$0xff]   ;;  %v721_v8 = vld [vmem:[#allocation7 + $0x10] sm:$0xff]   ;;  %v722_v9 = vld [vmem:[#allocation7 + $0x18] sm:$0xff]   ;;  %s477_s28 = sshll.u32 %s271_s11, 4  ;;  %s1127_s9 = scalar_lea.hbm %s1176_s5, %s601_s30  ;;  %s1122_s28 = int_to_ptr.vmem [resolvable:$true] %s477_s28 }
  0x6d   : > { %615 = vmatpush3.bf16.msra.mxu0 %v717_v1  ;;  %623 = vmatpush3.bf16.msra.mxu1 %v719_v5  ;;  %v723_v10 = vld [vmem:[#allocation7 + $0x20] sm:$0xff]   ;;  %v724_v11 = vld [vmem:[#allocation7 + $0x28] sm:$0xff]   ;;  %v725_v12 = vld [vmem:[#allocation7 + $0x30] sm:$0xff]   ;;  %s464_s12 = scalar_lea.sflag [#allocation4], %s1099_s29  ;;  %s813_s22 = scalar_lea.vmem %s1122_s28, 256 }
  0x6e   : > { %616 = vmatprep.subr.bf16.mxu0 %v892_v0  ;;  %624 = vmatprep.subr.bf16.mxu1 %v892_v0  ;;  %v726_v13 = vld [vmem:[#allocation7 + $0x38] sm:$0xff]   ;;  %v582_v14 = vld [vmem:[%s1173_s2] ss:$0 sm:$0xff]  ;;  %p814_p11 = scmp.ne.s32.totalorder %s1122_s28, %s813_s22  ;;  %p1190_p0 = scmp.ne.s32.totalorder %s1185_s23, 0 }
  0x6f   : > { %v586_v24 = vld [vmem:[%s1175_s4] ss:$0 sm:$0xff]  ;;  %s894_s13 = smov [#allocation8]  }
  0x70   : > { %p815_p1 = pnand %p814_p11, %p1190_p0  ;;  %s817_s17 = sshll.u32 %s894_s13, 4  ;;  %s818_s17 = int_to_ptr.vmem [resolvable:$false] %s817_s17 }
  0x71   : > { %617 = vmatpush3.bf16.msra.mxu0 %v718_v2  ;;  %625 = vmatpush3.bf16.msra.mxu1 %v720_v7  ;;  %s819_s7 = scalar_lea.vmem %s818_s17, 512  ;;  %p820_p7 = scmp.lt.s32.totalorder %s1122_s28, %s818_s17 }
  0x72   : > { %626 = vmatprep.subr.bf16.mxu1 %v892_v0  ;;  %p816_p3 = pneg %p815_p1  ;;  %p821_p9 = scmp.lt.s32.totalorder %s819_s7, %s813_s22 }
  0x74   : > { %619 = vmatmul.mubr.msk.bf16.vlgmr.msra.gmra.mrb[0].mxu0 %vm301_vm1, %v277_v6  ;;  %p822_p12 = por %p821_p9, %p820_p7 }
  0x75   : > { %627 = vmatpush3.bf16.msra.mxu1 %v721_v8 }
  0x76   : > { %628 = vmatprep.subr.bf16.mxu1 %v892_v0  ;;  %p823_p2 = pnand %p822_p12, %p816_p3 }
  0x79   : > { %629 = vmatpush3.bf16.msra.mxu1 %v722_v9 }
  0x7a   : > { %630 = vmatprep.subr.bf16.mxu1 %v892_v0 }
  0x7d   : > { %631 = vmatpush3.bf16.msra.mxu1 %v723_v10 }
  0x7e   : > { %632 = vmatprep.subr.bf16.mxu1 %v892_v0 }
  0x81   : > { %633 = vmatpush3.bf16.msra.mxu1 %v724_v11 }
  0x82   : > { %634 = vmatprep.subr.bf16.mxu1 %v892_v0 }
  0x85   : > { %635 = vmatpush3.bf16.msra.mxu1 %v725_v12 }
  0x86   : > { %636 = vmatprep.subr.bf16.mxu1 %v892_v0 }
  0x89   : > { %637 = vmatpush3.bf16.msra.mxu1 %v726_v13 }
 0x147   : > { %v339_v15 = vpop.f32.mrb[0].mxu0 }
 0x148   : > { %v340_v16 = vadd.f32 %v582_v14, %v339_v15  ;;  %v620_v17 = vpop.f32.mrb[1].mxu0 }
 0x149   : > { %v342_v18 = vpop.f32.mrb[2].mxu0 }
 0x14a   : > { %v343_v19 = vadd.f32 %v582_v14, %v342_v18  ;;  %v621_v20 = vpop.f32.mrb[3].mxu0  ;;  %v346_v21 = vmax.f32 %v340_v16, 0.0 }
 0x14c   : > { %v347_v22 = vmax.f32 %v343_v19, 0.0 }
 0x14e   : > { %v348_v23 = vpack.c.bf16 %v347_v22, %v346_v21 }
 0x150   : > { %639 = vmatmul.mubr.bf16.vlgmr.msra.gmra.mrb[0].mxu1 %v348_v23 }
 0x223   : > { %v454_v25 = vpop.f32.mrb[0].mxu1 }
 0x224   : > { %v455_v26 = vadd.f32 %v586_v24, %v454_v25  ;;  %v640_v27 = vpop.f32.mrb[1].mxu1 }
 0x225   : > { %v457_v28 = vpop.f32.mrb[2].mxu1 }
 0x226   : > { %461 = vst [vmem:[%s271_s11] sm:$0xff] %v455_v26  ;;  %v458_v29 = vadd.f32 %v586_v24, %v457_v28  ;;  %v641_v30 = vpop.f32.mrb[3].mxu1 }
 0x228   : > { %462 = vst [vmem:[%s271_s11 + $0x8] sm:$0xff] %v458_v29 }
 0x229   : > { %826 = shalt.err (!%p823_p2)
}
 0x22a   : > { %s827_s6 = scalar_lea.hbm %s1127_s9, 256  ;;  %s831_s8 = scalar_lea.hbm %s1176_s5, 512 }
 0x22b   : > { %p828_p13 = scmp.ne.s32.totalorder %s1127_s9, %s827_s6  ;;  %p832_p4 = scmp.lt.u32.totalorder %s1127_s9, %s1176_s5 }
 0x22c   : > { %p833_p5 = scmp.lt.u32.totalorder %s831_s8, %s827_s6  ;;  %p835_p11 = scmp.lt.u32.totalorder %s827_s6, %s1127_s9 }
 0x22d   : > { %p829_p6 = pnand %p828_p13, %p1190_p0 }
 0x22e   : > { %p834_p8 = por %p833_p5, %p832_p4 }
 0x22f   : > { %p830_p10 = pneg %p829_p6 }
 0x230   : > { %p836_p1 = por %p835_p11, %p834_p8 }
 0x232   : > { %p837_p3 = pnand %p836_p1, %p830_p10 }
 0x234   : > { %840 = shalt.err (!%p837_p3)
}
 0x235   : > { %s895_s30 = smov 128   ;;  %s896_s15 = smov 8  }
 0x236   : > { %652 = dma.vmem_to_hbm [thread:$0]  (%p1190_p0), %s1122_s28, 256, %s1127_s9, %s464_s12, %s895_s30, %s895_s30, %s896_s15  }
 0x237 PF: > { %s492_s16 = sand.u32 1, %s871_s18   ;;  %p1191_p7 = scmp.ne.s32.totalorder %s1181_s25, 0 }
 0x238   : > { %p1192_p9 = scmp.ge.s32.totalorder %s883_s21, 2  ;;  %s493_s22 = scalar_lea.sflag [#allocation4], %s492_s16 }
 0x23a   : > { %p666_p12 = pnand %p1192_p9, %p1191_p7 }
 0x23c   : > { %866 = dma.done.wait (!%p666_p12), %s493_s22, 256  }
 0x23d   : > { %868 = vsyncadd (!%p666_p12), %s493_s22, 4294967040  ;;  %p19_p2 = scmp.ge.s32.totalorder %s1037_s14, 4   ;;  %s1193_s18 = smov %s875_s19 }
 0x23e   : > { %s1194_s19 = smov %s879_s20  ;;  %s1195_s20 = smov %s1053_s27 }
 0x23f   : > { %s1196_s21 = smov %s1037_s14  ;;  %21 = sbr.rel (!%p19_p2) target bundleno = 6 (0x6), region = 93 }
 0x246   :  { %498 = vsyncpa [#allocation3], 1 }
 0x247   :  { %500 = vsyncpa [#allocation3 + $0x1], 1 }
 0x248   :  { %501 = vsyncpa [#allocation6], 1 }
 0x249   :  { %502 = vsyncpa [#allocation4], 1 }
 0x24a   :  { %504 = vsyncpa [#allocation4 + $0x1], 1 }

</bundles_post_ra>
